<compile_context>
chip_gen: v7x
topology: tpu7x:2x2x1
jax: 0.10.0
libtpu: 0.0.40
codegen_flags: <defaults>
</compile_context>

<pallas_src>
import functools

import jax
import jax.numpy as jnp
from jax.experimental import pallas as pl
from jax.experimental.pallas import tpu as pltpu

_LANE = 128    # TPU lane width (last-dim tiling unit)
_SUBLANE = 8   # f32 sublane width (second-to-last-dim tiling unit)


def _round_up(n, m):
    return ((n + m - 1) // m) * m


# ---------------------------------------------------------------------------
# Kernel: one batch tile (tb, In) -> (tb, O); weights fully resident in VMEM.
# ---------------------------------------------------------------------------
def mlp_kernel(x_ref, w1_ref, b1_ref, w2_ref, b2_ref, o_ref):
    x = x_ref[...]
    # MXU matmuls with f32 accumulation.  Weights may be bf16 for large In/H
    # (see prepare_params); activations are cast to match so the MXU sees
    # bf16 inputs, while the bias + ReLU epilogue stays in f32 on the VPU.
    h = jnp.dot(x.astype(w1_ref.dtype), w1_ref[...],
                preferred_element_type=jnp.float32)
    h = jnp.maximum(h + b1_ref[...], 0.0)
    y = jnp.dot(h.astype(w2_ref.dtype), w2_ref[...],
                preferred_element_type=jnp.float32)
    o_ref[...] = (y + b2_ref[...]).astype(o_ref.dtype)
    # NOTE: for very large H (hidden intermediate >> VMEM budget) add a
    # hidden-dim grid axis with a (tb, O) f32 accumulator scratch instead of
    # keeping the full (tb, H_p) intermediate live between the two dots.


# ---------------------------------------------------------------------------
# One-time parameter preparation (outside the per-call path).
# ---------------------------------------------------------------------------
def prepare_params(w1, b1, w2, b2):
    """Pad the hidden dim to the 128-lane MXU width and pick weight dtype.

    w1: (In, H); b1: (H,); w2: (H, O); b2: (O,)  (pre-transposed vs. PyTorch)
    Padding is zeros, so padded hidden columns contribute relu(0) * 0 = 0.
    """
    In, H = w1.shape
    O = w2.shape[1]
    H_p = _round_up(H, _LANE)

    # bf16 weights once the contraction dims are big enough to be MXU-bound;
    # keep f32 at toy sizes (bit-exact vs. the f32 reference).
    w_dtype = jnp.bfloat16 if max(In, H) >= 512 else jnp.float32

    w1_p = jnp.zeros((In, H_p), w_dtype).at[:, :H].set(w1.astype(w_dtype))
    w2_p = jnp.zeros((H_p, O), w_dtype).at[:H, :].set(w2.astype(w_dtype))
    b1_p = jnp.zeros((1, H_p), jnp.float32).at[0, :H].set(b1.astype(jnp.float32))
    b2_p = b2.astype(jnp.float32).reshape(1, O)
    return w1_p, b1_p, w2_p, b2_p


# ---------------------------------------------------------------------------
# Batch-tile selection from a per-generation VMEM budget.
# ---------------------------------------------------------------------------
def _pick_batch_tile(B, In, H_p, O, weight_bytes, vmem_budget):
    if B < _SUBLANE:
        return B  # full-extent batch block (< one sublane tile)
    In_l = _round_up(max(In, 1), _LANE)   # lane-padded VMEM footprint per row
    O_l = _round_up(max(O, 1), _LANE)
    # Per batch row: double-buffered x tile + double-buffered out tile + the
    # live f32 hidden intermediate.
    row_bytes = (2 * In_l + 2 * O_l + H_p) * 4
    avail = max(vmem_budget - weight_bytes, _SUBLANE * row_bytes)
    tb = (avail // row_bytes) // _SUBLANE * _SUBLANE
    tb = max(_SUBLANE, min(tb, 1024))          # >1k rows: diminishing returns
    tb = min(tb, _round_up(B, _SUBLANE))       # never larger than the batch
    if B > _SUBLANE:
        # Keep >= 2 batch tiles so both v7x TensorCores get work.
        tb = min(tb, _round_up((B + 1) // 2, _SUBLANE))
    return max(tb, _SUBLANE)


# ---------------------------------------------------------------------------
# Forward pass.
# ---------------------------------------------------------------------------
@functools.partial(jax.jit, static_argnames=("single_buffer_weights",))
def _forward(x, w1_p, b1_p, w2_p, b2_p, single_buffer_weights=True):
    B, In = x.shape
    H_p = w1_p.shape[1]
    O = w2_p.shape[1]

    # Per-generation VMEM budget (v7x: 64 MiB -> ~32 MiB tile budget / 48 MiB
    # scoped limit; v5e/v6e: 128 MiB -> ~64 / 96 MiB).
    try:
        vmem_cap = int(pltpu.get_tpu_info().vmem_capacity_bytes)
    except Exception:
        vmem_cap = 64 * 1024 * 1024
    w_itemsize = jnp.dtype(w1_p.dtype).itemsize
    # Conservative (2x) in case weights end up double-buffered on fallback.
    weight_bytes = (2 * (_round_up(In, _SUBLANE) * H_p
                         + H_p * _round_up(O, _LANE)) * w_itemsize
                    + (H_p + _round_up(O, _LANE)) * 4)
    tb = _pick_batch_tile(B, In, H_p, O, weight_bytes, vmem_cap // 2)
    vmem_limit = int(min(0.75 * vmem_cap, 100 * 2 ** 20))

    if single_buffer_weights:
        # Constant index_map -> a single resident copy instead of the default
        # 2-deep pipeline buffers (halves weight VMEM footprint).
        w_kwargs = dict(pipeline_mode=pl.Buffered(1))
    else:
        w_kwargs = {}

    grid = (pl.cdiv(B, tb),)
    return pl.pallas_call(
        mlp_kernel,
        out_shape=jax.ShapeDtypeStruct((B, O), x.dtype),
        grid=grid,
        in_specs=[
            # Batch-tiled activations: double-buffered DMA overlaps compute.
            pl.BlockSpec((tb, In), lambda i: (i, 0)),
            # Weights / biases: same block every step -> resident in VMEM.
            pl.BlockSpec((In, H_p), lambda i: (0, 0), **w_kwargs),
            pl.BlockSpec((1, H_p), lambda i: (0, 0), **w_kwargs),
            pl.BlockSpec((H_p, O), lambda i: (0, 0), **w_kwargs),
            pl.BlockSpec((1, O), lambda i: (0, 0), **w_kwargs),
        ],
        out_specs=pl.BlockSpec((tb, O), lambda i: (i, 0)),
        compiler_params=pltpu.CompilerParams(
            dimension_semantics=("parallel",),   # batch tiles are independent
            vmem_limit_bytes=vmem_limit,
        ),
    )(x, w1_p, b1_p, w2_p, b2_p)


_BUFFERED_WEIGHTS_OK = [True]


def simple_neural_network(x, w1_p, b1_p, w2_p, b2_p):
    """Forward pass y = relu(x @ W1 + b1) @ W2 + b2 (params from prepare_params)."""
    if _BUFFERED_WEIGHTS_OK[0]:
        try:
            return _forward(x, w1_p, b1_p, w2_p, b2_p,
                            single_buffer_weights=True)
        except Exception:
            # This JAX/Mosaic build doesn't support pipeline_mode on the outer
            # pallas_call grid; fall back to default double-buffered weights.
            _BUFFERED_WEIGHTS_OK[0] = False
    return _forward(x, w1_p, b1_p, w2_p, b2_p, single_buffer_weights=False)


if __name__ == "__main__":
    # Small shapes consistent with the module:
    # input_size=32, hidden_size=64, output_size=16
    batch, input_size, hidden_size, output_size = 8, 32, 64, 16

    key = jax.random.PRNGKey(0)
    kx, kw1, kb1, kw2, kb2 = jax.random.split(key, 5)

    x = jax.random.normal(kx, (batch, input_size), dtype=jnp.float32)
    # Deterministic parameter init (uniform, PyTorch-default Linear init scale)
    lim1 = 1.0 / (input_size ** 0.5)
    lim2 = 1.0 / (hidden_size ** 0.5)
    w1 = jax.random.uniform(kw1, (input_size, hidden_size), jnp.float32, -lim1, lim1)
    b1 = jax.random.uniform(kb1, (hidden_size,), jnp.float32, -lim1, lim1)
    w2 = jax.random.uniform(kw2, (hidden_size, output_size), jnp.float32, -lim2, lim2)
    b2 = jax.random.uniform(kb2, (output_size,), jnp.float32, -lim2, lim2)

    # One-time setup (pads hidden dim, picks weight dtype) — outside the
    # per-call path.
    params = prepare_params(w1, b1, w2, b2)

    out = simple_neural_network(x, *params)
    out = jax.block_until_ready(out)

    # Reference check in plain JAX
    ref = jnp.maximum(x @ w1 + b1, 0.0) @ w2 + b2
    assert out.shape == (batch, output_size)
    assert jnp.allclose(out, ref, atol=1e-5, rtol=1e-5)

    print("KERNEL_OK")
</pallas_src>

<mosaic_0001>
module attributes {stable_mosaic.version = 11 : i64} {
  func.func @mlp_kernel(%arg0: i32, %arg1: memref<8x32xf32, #tpu.memory_space<vmem>>, %arg2: memref<32x128xf32, #tpu.memory_space<vmem>>, %arg3: memref<1x128xf32, #tpu.memory_space<vmem>>, %arg4: memref<128x16xf32, #tpu.memory_space<vmem>>, %arg5: memref<1x16xf32, #tpu.memory_space<vmem>>, %arg6: memref<8x16xf32, #tpu.memory_space<vmem>>) attributes {dimension_semantics = [#tpu.dimension_semantics<parallel>], iteration_bounds = array<i64: 1>, scalar_prefetch = 0 : i64, scratch_operands = 0 : i64, tpu.core_type = #tpu.core_type<tc>, window_params = [{transform_indices = @transform_0, window_bounds = array<i64: 8, 32>}, {pipeline_mode = #tpu.pipeline_mode<synchronous>, transform_indices = @transform_1, window_bounds = array<i64: 32, 128>}, {pipeline_mode = #tpu.pipeline_mode<synchronous>, transform_indices = @transform_2, window_bounds = array<i64: 1, 128>}, {pipeline_mode = #tpu.pipeline_mode<synchronous>, transform_indices = @transform_3, window_bounds = array<i64: 128, 16>}, {pipeline_mode = #tpu.pipeline_mode<synchronous>, transform_indices = @transform_4, window_bounds = array<i64: 1, 16>}, {transform_indices = @transform_5, window_bounds = array<i64: 8, 16>}]} {
    %c0 = arith.constant 0 : index
    %c0_0 = arith.constant 0 : index
    %0 = vector.load %arg1[%c0, %c0_0] : memref<8x32xf32, #tpu.memory_space<vmem>>, vector<8x32xf32>
    %c0_1 = arith.constant 0 : index
    %c0_2 = arith.constant 0 : index
    %1 = vector.load %arg2[%c0_1, %c0_2] : memref<32x128xf32, #tpu.memory_space<vmem>>, vector<32x128xf32>
    %cst = arith.constant dense<0.000000e+00> : vector<8x128xf32>
    %2 = tpu.matmul %0, %1, %cst {dimension_numbers = #tpu.dot_dimension_numbers<[1], [0], [0], [1], [0, 0, 1, 1], [], []>} : vector<8x32xf32>, vector<32x128xf32>, vector<8x128xf32> -> vector<8x128xf32>
    %c0_3 = arith.constant 0 : index
    %c0_4 = arith.constant 0 : index
    %3 = vector.load %arg3[%c0_3, %c0_4] : memref<1x128xf32, #tpu.memory_space<vmem>>, vector<1x128xf32>
    %4 = vector.broadcast %3 : vector<1x128xf32> to vector<8x128xf32>
    %5 = arith.addf %2, %4 : vector<8x128xf32>
    %cst_5 = arith.constant 0.000000e+00 : f32
    %6 = vector.broadcast %cst_5 : f32 to vector<8x128xf32>
    %7 = arith.maximumf %5, %6 : vector<8x128xf32>
    %c0_6 = arith.constant 0 : index
    %c0_7 = arith.constant 0 : index
    %8 = vector.load %arg4[%c0_6, %c0_7] : memref<128x16xf32, #tpu.memory_space<vmem>>, vector<128x16xf32>
    %cst_8 = arith.constant dense<0.000000e+00> : vector<8x16xf32>
    %9 = tpu.matmul %7, %8, %cst_8 {dimension_numbers = #tpu.dot_dimension_numbers<[1], [0], [0], [1], [0, 0, 1, 1], [], []>} : vector<8x128xf32>, vector<128x16xf32>, vector<8x16xf32> -> vector<8x16xf32>
    %c0_9 = arith.constant 0 : index
    %c0_10 = arith.constant 0 : index
    %10 = vector.load %arg5[%c0_9, %c0_10] : memref<1x16xf32, #tpu.memory_space<vmem>>, vector<1x16xf32>
    %11 = vector.broadcast %10 : vector<1x16xf32> to vector<8x16xf32>
    %12 = arith.addf %9, %11 : vector<8x16xf32>
    %c0_11 = arith.constant 0 : index
    %c0_12 = arith.constant 0 : index
    %13 = vector.load %arg6[%c0_11, %c0_12] : memref<8x16xf32, #tpu.memory_space<vmem>>, vector<8x16xf32>
    tpu.vector_store %arg6[%c0_11, %c0_12], %12 {strides = array<i32>} : memref<8x16xf32, #tpu.memory_space<vmem>>, vector<8x16xf32>,
    return
  }
  func.func @transform_0(%arg0: i32) -> (i32, i32) {
    %c0_i32 = arith.constant 0 : i32
    %c0_i32_0 = arith.constant 0 : i32
    return %arg0, %c0_i32 : i32, i32
  }
  func.func @transform_1(%arg0: i32) -> (i32, i32) {
    %c0_i32 = arith.constant 0 : i32
    %c0_i32_0 = arith.constant 0 : i32
    %c0_i32_1 = arith.constant 0 : i32
    return %c0_i32, %c0_i32_0 : i32, i32
  }
  func.func @transform_2(%arg0: i32) -> (i32, i32) {
    %c0_i32 = arith.constant 0 : i32
    %c0_i32_0 = arith.constant 0 : i32
    %c0_i32_1 = arith.constant 0 : i32
    return %c0_i32, %c0_i32_0 : i32, i32
  }
  func.func @transform_3(%arg0: i32) -> (i32, i32) {
    %c0_i32 = arith.constant 0 : i32
    %c0_i32_0 = arith.constant 0 : i32
    %c0_i32_1 = arith.constant 0 : i32
    return %c0_i32, %c0_i32_0 : i32, i32
  }
  func.func @transform_4(%arg0: i32) -> (i32, i32) {
    %c0_i32 = arith.constant 0 : i32
    %c0_i32_0 = arith.constant 0 : i32
    %c0_i32_1 = arith.constant 0 : i32
    return %c0_i32, %c0_i32_0 : i32, i32
  }
  func.func @transform_5(%arg0: i32) -> (i32, i32) {
    %c0_i32 = arith.constant 0 : i32
    %c0_i32_0 = arith.constant 0 : i32
    return %arg0, %c0_i32 : i32, i32
  }
}

module attributes {stable_mosaic.version = 11 : i64} {
  func.func @mlp_kernel(%arg0: i32, %arg1: memref<8x32xf32, #tpu.memory_space<vmem>>, %arg2: memref<32x128xf32, #tpu.memory_space<vmem>>, %arg3: memref<1x128xf32, #tpu.memory_space<vmem>>, %arg4: memref<128x16xf32, #tpu.memory_space<vmem>>, %arg5: memref<1x16xf32, #tpu.memory_space<vmem>>, %arg6: memref<8x16xf32, #tpu.memory_space<vmem>>) attributes {dimension_semantics = [#tpu.dimension_semantics<parallel>], iteration_bounds = array<i64: 1>, scalar_prefetch = 0 : i64, scratch_operands = 0 : i64, tpu.core_type = #tpu.core_type<tc>, window_params = [{transform_indices = @transform_0, window_bounds = array<i64: 8, 32>}, {pipeline_mode = #tpu.pipeline_mode<synchronous>, transform_indices = @transform_1, window_bounds = array<i64: 32, 128>}, {pipeline_mode = #tpu.pipeline_mode<synchronous>, transform_indices = @transform_2, window_bounds = array<i64: 1, 128>}, {pipeline_mode = #tpu.pipeline_mode<synchronous>, transform_indices = @transform_3, window_bounds = array<i64: 128, 16>}, {pipeline_mode = #tpu.pipeline_mode<synchronous>, transform_indices = @transform_4, window_bounds = array<i64: 1, 16>}, {transform_indices = @transform_5, window_bounds = array<i64: 8, 16>}]} {
    %c0 = arith.constant 0 : index
    %c0_0 = arith.constant 0 : index
    %0 = vector.load %arg1[%c0, %c0_0] : memref<8x32xf32, #tpu.memory_space<vmem>>, vector<8x32xf32>
    %c0_1 = arith.constant 0 : index
    %c0_2 = arith.constant 0 : index
    %1 = vector.load %arg2[%c0_1, %c0_2] : memref<32x128xf32, #tpu.memory_space<vmem>>, vector<32x128xf32>
    %cst = arith.constant dense<0.000000e+00> : vector<8x128xf32>
    %2 = tpu.matmul %0, %1, %cst {dimension_numbers = #tpu.dot_dimension_numbers<[1], [0], [0], [1], [0, 0, 1, 1], [], []>} : vector<8x32xf32>, vector<32x128xf32>, vector<8x128xf32> -> vector<8x128xf32>
    %c0_3 = arith.constant 0 : index
    %c0_4 = arith.constant 0 : index
    %3 = vector.load %arg3[%c0_3, %c0_4] : memref<1x128xf32, #tpu.memory_space<vmem>>, vector<1x128xf32>
    %4 = vector.broadcast %3 : vector<1x128xf32> to vector<8x128xf32>
    %5 = arith.addf %2, %4 : vector<8x128xf32>
    %cst_5 = arith.constant 0.000000e+00 : f32
    %6 = vector.broadcast %cst_5 : f32 to vector<8x128xf32>
    %7 = arith.maximumf %5, %6 : vector<8x128xf32>
    %c0_6 = arith.constant 0 : index
    %c0_7 = arith.constant 0 : index
    %8 = vector.load %arg4[%c0_6, %c0_7] : memref<128x16xf32, #tpu.memory_space<vmem>>, vector<128x16xf32>
    %cst_8 = arith.constant dense<0.000000e+00> : vector<8x16xf32>
    %9 = tpu.matmul %7, %8, %cst_8 {dimension_numbers = #tpu.dot_dimension_numbers<[1], [0], [0], [1], [0, 0, 1, 1], [], []>} : vector<8x128xf32>, vector<128x16xf32>, vector<8x16xf32> -> vector<8x16xf32>
    %c0_9 = arith.constant 0 : index
    %c0_10 = arith.constant 0 : index
    %10 = vector.load %arg5[%c0_9, %c0_10] : memref<1x16xf32, #tpu.memory_space<vmem>>, vector<1x16xf32>
    %11 = vector.broadcast %10 : vector<1x16xf32> to vector<8x16xf32>
    %12 = arith.addf %9, %11 : vector<8x16xf32>
    %c0_11 = arith.constant 0 : index
    %c0_12 = arith.constant 0 : index
    %13 = vector.load %arg6[%c0_11, %c0_12] : memref<8x16xf32, #tpu.memory_space<vmem>>, vector<8x16xf32>
    tpu.vector_store %arg6[%c0_11, %c0_12], %12 {strides = array<i32>} : memref<8x16xf32, #tpu.memory_space<vmem>>, vector<8x16xf32>,
    return
  }
  func.func @transform_0(%arg0: i32) -> (i32, i32) {
    %c0_i32 = arith.constant 0 : i32
    %c0_i32_0 = arith.constant 0 : i32
    return %arg0, %c0_i32 : i32, i32
  }
  func.func @transform_1(%arg0: i32) -> (i32, i32) {
    %c0_i32 = arith.constant 0 : i32
    %c0_i32_0 = arith.constant 0 : i32
    %c0_i32_1 = arith.constant 0 : i32
    return %c0_i32, %c0_i32_0 : i32, i32
  }
  func.func @transform_2(%arg0: i32) -> (i32, i32) {
    %c0_i32 = arith.constant 0 : i32
    %c0_i32_0 = arith.constant 0 : i32
    %c0_i32_1 = arith.constant 0 : i32
    return %c0_i32, %c0_i32_0 : i32, i32
  }
  func.func @transform_3(%arg0: i32) -> (i32, i32) {
    %c0_i32 = arith.constant 0 : i32
    %c0_i32_0 = arith.constant 0 : i32
    %c0_i32_1 = arith.constant 0 : i32
    return %c0_i32, %c0_i32_0 : i32, i32
  }
  func.func @transform_4(%arg0: i32) -> (i32, i32) {
    %c0_i32 = arith.constant 0 : i32
    %c0_i32_0 = arith.constant 0 : i32
    %c0_i32_1 = arith.constant 0 : i32
    return %c0_i32, %c0_i32_0 : i32, i32
  }
  func.func @transform_5(%arg0: i32) -> (i32, i32) {
    %c0_i32 = arith.constant 0 : i32
    %c0_i32_0 = arith.constant 0 : i32
    return %arg0, %c0_i32 : i32, i32
  }
}

</mosaic_0001>

<bundles_post_ra>
// kernel: _forward.1
= control target key start
LH: loop header
LB: loop body
LE: loop exit
PB: predicated region body
PF: predicated region fallthrough
CT: control target
= control target key end

     0   :  { %v346_v3 = vmov 0.0|0.0   ;;  %vm347_vm0 = vmmov 0   ;;  %v348_v6 = vmov 0.0   ;;  %s461_s0 = inlined_call_operand.vmem [shape: f32[8,32], index: 0, kind: input, shape index: {}]   ;;  %s462_s1 = inlined_call_operand.vmem [shape: f32[32,128], index: 1, kind: input, shape index: {}]   ;;  %s463_s2 = inlined_call_operand.vmem [shape: f32[1,128], index: 2, kind: input, shape index: {}]   ;;  %s464_s3 = inlined_call_operand.vmem [shape: f32[128,16], index: 3, kind: input, shape index: {}]   ;;  %s465_s4 = inlined_call_operand.vmem [shape: f32[1,16], index: 4, kind: input, shape index: {}]   ;;  %s466_s5 = inlined_call_operand.hbm [shape: f32[8,16], index: 5, kind: output, shape index: {}]  }
   0x1   :  { %v22_v0 = vld [vmem:[%s462_s1] sm:$0xff]  ;;  %v23_v1 = vld [vmem:[%s462_s1 + $0x8] sm:$0xff]  ;;  %v24_v2 = vld [vmem:[%s462_s1 + $0x10] sm:$0xff]  ;;  %288 = vmatprep.subr.bf16.mxu0 %v346_v3  ;;  %250 = vmatprep.mubr.msk.f32.mxu0 %vm347_vm0, %v348_v6 }
   0x2   :  { %v289_v4 = vpack.c.bf16 %v23_v1, %v22_v0  ;;  %v25_v5 = vld [vmem:[%s462_s1 + $0x18] sm:$0xff]  ;;  %v108_v7 = vld [vmem:[%s464_s3] sm:$0xff]  ;;  %294 = vmatprep.subr.bf16.mxu1 %v346_v3  ;;  %v109_v8 = vld [vmem:[%s464_s3 + $0x8] sm:$0xff]  ;;  %285 = vmatprep.mubr.msk.f32.mxu1 %vm347_vm0, %v348_v6 }
   0x3   :  { %v110_v9 = vld [vmem:[%s464_s3 + $0x10] sm:$0xff]  ;;  %v111_v10 = vld [vmem:[%s464_s3 + $0x18] sm:$0xff]  ;;  %v292_v11 = vpack.c.bf16 %v25_v5, %v24_v2  ;;  %v295_v12 = vpack.c.bf16 %v109_v8, %v108_v7  ;;  %v112_v14 = vld [vmem:[%s464_s3 + $0x20] sm:$0xff] }
   0x4   :  { %290 = vmatpush3.bf16.msra.mxu0 %v289_v4  ;;  %v298_v13 = vpack.c.bf16 %v111_v10, %v110_v9  ;;  %v113_v15 = vld [vmem:[%s464_s3 + $0x28] sm:$0xff] }
   0x5   :  { %291 = vmatprep.subr.bf16.mxu0 %v346_v3  ;;  %296 = vmatpush3.bf16.msra.mxu1 %v295_v12 }
   0x6   :  { %297 = vmatprep.subr.bf16.mxu1 %v346_v3 }
   0x7   :  { %10 = vsyncpa [#allocation3], 0  ;;  %v21_v16 = vld [vmem:[%s461_s0] sm:$0xff]  ;;  %vm33_vm1 = vcmask 261120   ;;  %v301_v17 = vpack.c.bf16 %v113_v15, %v112_v14  ;;  %v114_v18 = vld [vmem:[%s464_s3 + $0x30] sm:$0xff]  ;;  %s349_s11 = smov [#allocation2]  }
   0x8   :  { %293 = vmatpush3.bf16.msra.mxu0 %v292_v11  ;;  %v115_v19 = vld [vmem:[%s464_s3 + $0x38] sm:$0xff]  ;;  %v116_v21 = vld [vmem:[%s464_s3 + $0x40] sm:$0xff]  ;;  %v117_v22 = vld [vmem:[%s464_s3 + $0x48] sm:$0xff]  ;;  %s209_s12 = sshll.u32 %s349_s11, 4  ;;  %vm201_vm2 = vcmask 130048   ;;  %s210_s12 = int_to_ptr.vmem [resolvable:$true] %s209_s12 }
   0x9   :  { %299 = vmatpush3.bf16.msra.mxu1 %v298_v13  ;;  %v304_v20 = vpack.c.bf16 %v115_v19, %v114_v18  ;;  %v307_v23 = vpack.c.bf16 %v117_v22, %v116_v21  ;;  %v118_v24 = vld [vmem:[%s464_s3 + $0x50] sm:$0xff]  ;;  %v119_v25 = vld [vmem:[%s464_s3 + $0x58] sm:$0xff]  ;;  %v120_v27 = vld [vmem:[%s464_s3 + $0x60] sm:$0xff]  ;;  %p327_p1 = scmp.lt.s32.totalorder %s210_s12, %s210_s12 }
   0xa   :  { %300 = vmatprep.subr.bf16.mxu1 %v346_v3  ;;  %v310_v26 = vpack.c.bf16 %v119_v25, %v118_v24  ;;  %v121_v28 = vld [vmem:[%s464_s3 + $0x68] sm:$0xff]  ;;  %v122_v30 = vld [vmem:[%s464_s3 + $0x70] sm:$0xff]  ;;  %v123_v31 = vld [vmem:[%s464_s3 + $0x78] sm:$0xff]  ;;  %s322_s3 = scalar_lea.vmem %s210_s12, 128 }
   0xb   :  { %251 = vmatmul.mubr.msk.f32.vlgmr.msra.gmra.mrb[0].mxu0 %vm33_vm1, %v21_v16  ;;  %v313_v29 = vpack.c.bf16 %v121_v28, %v120_v27  ;;  %v316_v32 = vpack.c.bf16 %v123_v31, %v122_v30  ;;  %v217_v33 = vld [vmem:[%s463_s2] ss:$0 sm:$0xff]  ;;  %p323_p0 = scmp.ne.s32.totalorder %s210_s12, %s322_s3  ;;  %p328_p2 = scmp.lt.s32.totalorder %s322_s3, %s322_s3 }
   0xc   :  { %v219_v38 = vld [vmem:[%s465_s4] ss:$0 sm:$0xff] }
   0xd   :  { %302 = vmatpush3.bf16.msra.mxu1 %v301_v17  ;;  %p329_p3 = por %p328_p2, %p327_p1 }
   0xe   :  { %303 = vmatprep.subr.bf16.mxu1 %v346_v3 }
   0xf   :  { %p330_p4 = pnand %p329_p3, %p323_p0 }
  0x11   :  { %305 = vmatpush3.bf16.msra.mxu1 %v304_v20 }
  0x12   :  { %306 = vmatprep.subr.bf16.mxu1 %v346_v3 }
  0x15   :  { %308 = vmatpush3.bf16.msra.mxu1 %v307_v23 }
  0x16   :  { %309 = vmatprep.subr.bf16.mxu1 %v346_v3 }
  0x19   :  { %311 = vmatpush3.bf16.msra.mxu1 %v310_v26 }
  0x1a   :  { %312 = vmatprep.subr.bf16.mxu1 %v346_v3 }
  0x1d   :  { %314 = vmatpush3.bf16.msra.mxu1 %v313_v29 }
  0x1e   :  { %315 = vmatprep.subr.bf16.mxu1 %v346_v3 }
  0x21   :  { %317 = vmatpush3.bf16.msra.mxu1 %v316_v32 }
  0xde   :  { %v103_v34 = vpop.f32.mrb[0].mxu0 }
  0xdf   :  { %v104_v35 = vadd.f32 %v217_v33, %v103_v34  ;;  %v252_v36 = vpop.f32.mrb[1].mxu0 }
  0xe1   :  { %v107_v37 = vmax.f32 %v104_v35, 0.0 }
  0xe3   :  { %286 = vmatmul.mubr.f32.vlgmr.msra.gmra.mrb[0].mxu1 %v107_v37 }
 0x1b6   :  { %v197_v39 = vpop.f32.mrb[0].mxu1 }
 0x1b7   :  { %v198_v40 = vadd.f32 %v219_v38, %v197_v39  ;;  %v287_v41 = vpop.f32.mrb[1].mxu1 }
 0x1b9   :  { %202 = vst.msk [vmem:[#allocation2] sm:$0xff] %vm201_vm2, %v198_v40 }
 0x1ba   :  { %333 = shalt.err (!%p330_p4)
}
 0x1bb   :  { %s334_s14 = scalar_lea.hbm %s466_s5, 128 }
 0x1bc   :  { %p335_p5 = scmp.ne.s32.totalorder %s466_s5, %s334_s14  ;;  %p338_p6 = scmp.lt.u32.totalorder %s334_s14, %s466_s5 }
 0x1be   :  { %p340_p7 = pnand %p338_p6, %p335_p5 }
 0x1c0   :  { %343 = shalt.err (!%p340_p7)
}
 0x1c1   :  { %212 = dma.vmem_to_hbm [thread:$0]  %s210_s12, 128, %s466_s5, [#allocation3]  }
 0x1c2   :  { %344 = dma.done.wait [#allocation3], 128  }
 0x1c3   :  { %345 = vsyncadd [#allocation3], 4294967168 }
 0x1c4   :  { %216 = vsyncpa [#allocation3], 1 }

// kernel: _forward.1
= control target key start
LH: loop header
LB: loop body
LE: loop exit
PB: predicated region body
PF: predicated region fallthrough
CT: control target
= control target key end

     0   :  { %v346_v3 = vmov 0.0|0.0   ;;  %vm347_vm0 = vmmov 0   ;;  %v348_v6 = vmov 0.0   ;;  %s461_s0 = inlined_call_operand.vmem [shape: f32[8,32], index: 0, kind: input, shape index: {}]   ;;  %s462_s1 = inlined_call_operand.vmem [shape: f32[32,128], index: 1, kind: input, shape index: {}]   ;;  %s463_s2 = inlined_call_operand.vmem [shape: f32[1,128], index: 2, kind: input, shape index: {}]   ;;  %s464_s3 = inlined_call_operand.vmem [shape: f32[128,16], index: 3, kind: input, shape index: {}]   ;;  %s465_s4 = inlined_call_operand.vmem [shape: f32[1,16], index: 4, kind: input, shape index: {}]   ;;  %s466_s5 = inlined_call_operand.hbm [shape: f32[8,16], index: 5, kind: output, shape index: {}]  }
   0x1   :  { %v22_v0 = vld [vmem:[%s462_s1] sm:$0xff]  ;;  %v23_v1 = vld [vmem:[%s462_s1 + $0x8] sm:$0xff]  ;;  %v24_v2 = vld [vmem:[%s462_s1 + $0x10] sm:$0xff]  ;;  %288 = vmatprep.subr.bf16.mxu0 %v346_v3  ;;  %250 = vmatprep.mubr.msk.f32.mxu0 %vm347_vm0, %v348_v6 }
   0x2   :  { %v289_v4 = vpack.c.bf16 %v23_v1, %v22_v0  ;;  %v25_v5 = vld [vmem:[%s462_s1 + $0x18] sm:$0xff]  ;;  %v108_v7 = vld [vmem:[%s464_s3] sm:$0xff]  ;;  %294 = vmatprep.subr.bf16.mxu1 %v346_v3  ;;  %v109_v8 = vld [vmem:[%s464_s3 + $0x8] sm:$0xff]  ;;  %285 = vmatprep.mubr.msk.f32.mxu1 %vm347_vm0, %v348_v6 }
   0x3   :  { %v110_v9 = vld [vmem:[%s464_s3 + $0x10] sm:$0xff]  ;;  %v111_v10 = vld [vmem:[%s464_s3 + $0x18] sm:$0xff]  ;;  %v292_v11 = vpack.c.bf16 %v25_v5, %v24_v2  ;;  %v295_v12 = vpack.c.bf16 %v109_v8, %v108_v7  ;;  %v112_v14 = vld [vmem:[%s464_s3 + $0x20] sm:$0xff] }
   0x4   :  { %290 = vmatpush3.bf16.msra.mxu0 %v289_v4  ;;  %v298_v13 = vpack.c.bf16 %v111_v10, %v110_v9  ;;  %v113_v15 = vld [vmem:[%s464_s3 + $0x28] sm:$0xff] }
   0x5   :  { %291 = vmatprep.subr.bf16.mxu0 %v346_v3  ;;  %296 = vmatpush3.bf16.msra.mxu1 %v295_v12 }
   0x6   :  { %297 = vmatprep.subr.bf16.mxu1 %v346_v3 }
   0x7   :  { %10 = vsyncpa [#allocation3], 0  ;;  %v21_v16 = vld [vmem:[%s461_s0] sm:$0xff]  ;;  %vm33_vm1 = vcmask 261120   ;;  %v301_v17 = vpack.c.bf16 %v113_v15, %v112_v14  ;;  %v114_v18 = vld [vmem:[%s464_s3 + $0x30] sm:$0xff]  ;;  %s349_s11 = smov [#allocation2]  }
   0x8   :  { %293 = vmatpush3.bf16.msra.mxu0 %v292_v11  ;;  %v115_v19 = vld [vmem:[%s464_s3 + $0x38] sm:$0xff]  ;;  %v116_v21 = vld [vmem:[%s464_s3 + $0x40] sm:$0xff]  ;;  %v117_v22 = vld [vmem:[%s464_s3 + $0x48] sm:$0xff]  ;;  %s209_s12 = sshll.u32 %s349_s11, 4  ;;  %vm201_vm2 = vcmask 130048   ;;  %s210_s12 = int_to_ptr.vmem [resolvable:$true] %s209_s12 }
   0x9   :  { %299 = vmatpush3.bf16.msra.mxu1 %v298_v13  ;;  %v304_v20 = vpack.c.bf16 %v115_v19, %v114_v18  ;;  %v307_v23 = vpack.c.bf16 %v117_v22, %v116_v21  ;;  %v118_v24 = vld [vmem:[%s464_s3 + $0x50] sm:$0xff]  ;;  %v119_v25 = vld [vmem:[%s464_s3 + $0x58] sm:$0xff]  ;;  %v120_v27 = vld [vmem:[%s464_s3 + $0x60] sm:$0xff]  ;;  %p327_p1 = scmp.lt.s32.totalorder %s210_s12, %s210_s12 }
   0xa   :  { %300 = vmatprep.subr.bf16.mxu1 %v346_v3  ;;  %v310_v26 = vpack.c.bf16 %v119_v25, %v118_v24  ;;  %v121_v28 = vld [vmem:[%s464_s3 + $0x68] sm:$0xff]  ;;  %v122_v30 = vld [vmem:[%s464_s3 + $0x70] sm:$0xff]  ;;  %v123_v31 = vld [vmem:[%s464_s3 + $0x78] sm:$0xff]  ;;  %s322_s3 = scalar_lea.vmem %s210_s12, 128 }
   0xb   :  { %251 = vmatmul.mubr.msk.f32.vlgmr.msra.gmra.mrb[0].mxu0 %vm33_vm1, %v21_v16  ;;  %v313_v29 = vpack.c.bf16 %v121_v28, %v120_v27  ;;  %v316_v32 = vpack.c.bf16 %v123_v31, %v122_v30  ;;  %v217_v33 = vld [vmem:[%s463_s2] ss:$0 sm:$0xff]  ;;  %p323_p0 = scmp.ne.s32.totalorder %s210_s12, %s322_s3  ;;  %p328_p2 = scmp.lt.s32.totalorder %s322_s3, %s322_s3 }
   0xc   :  { %v219_v38 = vld [vmem:[%s465_s4] ss:$0 sm:$0xff] }
   0xd   :  { %302 = vmatpush3.bf16.msra.mxu1 %v301_v17  ;;  %p329_p3 = por %p328_p2, %p327_p1 }
   0xe   :  { %303 = vmatprep.subr.bf16.mxu1 %v346_v3 }
   0xf   :  { %p330_p4 = pnand %p329_p3, %p323_p0 }
  0x11   :  { %305 = vmatpush3.bf16.msra.mxu1 %v304_v20 }
  0x12   :  { %306 = vmatprep.subr.bf16.mxu1 %v346_v3 }
  0x15   :  { %308 = vmatpush3.bf16.msra.mxu1 %v307_v23 }
  0x16   :  { %309 = vmatprep.subr.bf16.mxu1 %v346_v3 }
  0x19   :  { %311 = vmatpush3.bf16.msra.mxu1 %v310_v26 }
  0x1a   :  { %312 = vmatprep.subr.bf16.mxu1 %v346_v3 }
  0x1d   :  { %314 = vmatpush3.bf16.msra.mxu1 %v313_v29 }
  0x1e   :  { %315 = vmatprep.subr.bf16.mxu1 %v346_v3 }
  0x21   :  { %317 = vmatpush3.bf16.msra.mxu1 %v316_v32 }
  0xde   :  { %v103_v34 = vpop.f32.mrb[0].mxu0 }
  0xdf   :  { %v104_v35 = vadd.f32 %v217_v33, %v103_v34  ;;  %v252_v36 = vpop.f32.mrb[1].mxu0 }
  0xe1   :  { %v107_v37 = vmax.f32 %v104_v35, 0.0 }
  0xe3   :  { %286 = vmatmul.mubr.f32.vlgmr.msra.gmra.mrb[0].mxu1 %v107_v37 }
 0x1b6   :  { %v197_v39 = vpop.f32.mrb[0].mxu1 }
 0x1b7   :  { %v198_v40 = vadd.f32 %v219_v38, %v197_v39  ;;  %v287_v41 = vpop.f32.mrb[1].mxu1 }
 0x1b9   :  { %202 = vst.msk [vmem:[#allocation2] sm:$0xff] %vm201_vm2, %v198_v40 }
 0x1ba   :  { %333 = shalt.err (!%p330_p4)
}
 0x1bb   :  { %s334_s14 = scalar_lea.hbm %s466_s5, 128 }
 0x1bc   :  { %p335_p5 = scmp.ne.s32.totalorder %s466_s5, %s334_s14  ;;  %p338_p6 = scmp.lt.u32.totalorder %s334_s14, %s466_s5 }
 0x1be   :  { %p340_p7 = pnand %p338_p6, %p335_p5 }
 0x1c0   :  { %343 = shalt.err (!%p340_p7)
}
 0x1c1   :  { %212 = dma.vmem_to_hbm [thread:$0]  %s210_s12, 128, %s466_s5, [#allocation3]  }
 0x1c2   :  { %344 = dma.done.wait [#allocation3], 128  }
 0x1c3   :  { %345 = vsyncadd [#allocation3], 4294967168 }
 0x1c4   :  { %216 = vsyncpa [#allocation3], 1 }

</bundles_post_ra>
